<compile_context>
chip_gen: v6e
topology: v6e:2x2x1
jax: 0.10.0
libtpu: 0.0.40
codegen_flags: <defaults>
</compile_context>

<pallas_src>
import functools

import jax
import jax.numpy as jnp
from jax.experimental import pallas as pl
from jax.experimental.pallas import tpu as pltpu


# ---------------------------------------------------------------------------
# Shared compute helper: bias-free deconv-as-matmul on a lane tile.
#   w : (C4, Cin) array (already loaded),  x : (Cin, tl) array
#   returns y : (C4, tl) float32
# ---------------------------------------------------------------------------
def _affine_no_bias(w, x, cin):
    if cin <= 16:
        # Unrolled VPU broadcast-FMAs: (C4,1) * (1,tl) outer-product accumulate.
        y = w[:, 0:1] * x[0:1, :]
        for ci in range(1, cin):
            y = y + w[:, ci:ci + 1] * x[ci:ci + 1, :]
        return y
    return jax.lax.dot_general(
        w, x, (((1,), (0,)), ((), ())), preferred_element_type=jnp.float32)


# ---------------------------------------------------------------------------
# Kernel 1: per-block partial column statistics of the bias-free deconv output.
#   Emits (C4,1) partial sum and sum-of-squares per grid block (no accumulator
#   -> fully "parallel" grid, race-free on megacore).
# ---------------------------------------------------------------------------
def _stats_kernel(cin, x_ref, w_ref, sum_ref, sq_ref):
    x = x_ref[0]                       # (Cin, tl)
    w = w_ref[...]                     # (C4, Cin)
    y = _affine_no_bias(w, x, cin)     # (C4, tl), no bias
    sum_ref[0, 0] = jnp.sum(y, axis=1, keepdims=True)
    sq_ref[0, 0] = jnp.sum(y * y, axis=1, keepdims=True)


# ---------------------------------------------------------------------------
# Kernel 2: recompute deconv + fused BatchNorm (scale/shift, bias folded in)
#           + LeakyReLU(0.2); lane-dense (C4, tl) stores.
# ---------------------------------------------------------------------------
def _bn_lrelu_kernel(cin, x_ref, w_ref, scale_ref, shift_ref, o_ref):
    x = x_ref[0]                       # (Cin, tl)
    w = w_ref[...]                     # (C4, Cin)
    y = _affine_no_bias(w, x, cin)     # (C4, tl)
    z = y * scale_ref[...] + shift_ref[...]   # (C4,1) broadcast over lanes
    o_ref[0] = jnp.where(z >= 0, z, 0.2 * z)


def _pick_lane_tile(hw, cin, c4, max_tl=4096, vmem_budget=8 << 20):
    """Lane-tile size and padded HW.  Tile is a multiple of 128 whenever the
    lane axis is actually tiled; sized against a conservative VMEM budget so the
    double-buffered blocks stay well inside v7x's 64 MiB physical VMEM."""
    if hw <= max_tl:
        return hw, hw                  # single full-extent lane block, no pad
    per_lane = 4 * (2 * cin + 3 * c4)  # dbl-buffered x + out blocks + y temp
    tl = max_tl
    while tl > 256 and tl * per_lane > vmem_budget:
        tl //= 2
    hwp = ((hw + tl - 1) // tl) * tl
    return tl, hwp


def deconv_block_forward(x_nchw, weight, bias, gamma, beta, *, eps=1e-5):
    """ConvTranspose2d(k=2,s=2,p=0) + BatchNorm2d (batch stats) + LeakyReLU(0.2).

    x_nchw : (N, Cin, H, W) float32
    weight : (Cin, Cout, 2, 2)   (PyTorch ConvTranspose2d layout)
    bias   : (Cout,)
    gamma, beta : (Cout,) BatchNorm affine parameters
    returns: (N, Cout, 2H, 2W) float32
    """
    N, Cin, H, W = x_nchw.shape
    assert weight.shape[0] == Cin
    Cout, KH, KW = weight.shape[1], weight.shape[2], weight.shape[3]
    assert (KH, KW) == (2, 2), "DeconvBlock uses kernel_size=stride=2, padding=0"
    C4 = Cout * KH * KW
    HW = H * W
    M = N * HW                         # input pixels == entries per y column

    f32 = jnp.float32
    x_nchw = x_nchw.astype(f32)
    # weight (Cin,Cout,kh,kw) -> Wt (C4, Cin), rows ordered (co, kh, kw)
    w_t = jnp.transpose(weight.astype(f32), (1, 2, 3, 0)).reshape(C4, Cin)
    b_col = jnp.repeat(bias.astype(f32), KH * KW)          # (C4,)

    # Free reshape (no data movement): pixel index on the lane axis.
    x3 = x_nchw.reshape(N, Cin, HW)
    tl, HWp = _pick_lane_tile(HW, Cin, C4)
    if HWp != HW:
        x3 = jnp.pad(x3, ((0, 0), (0, 0), (0, HWp - HW)))
    nL = HWp // tl

    cparams = pltpu.CompilerParams(
        dimension_semantics=("parallel", "parallel"),
        vmem_limit_bytes=32 * 1024 * 1024,   # portable budget (v7x: 64 MiB phys)
    )

    # --- pass 1: partial column stats of the bias-free deconv (tiny outputs) --
    psum, psq = pl.pallas_call(
        functools.partial(_stats_kernel, Cin),
        out_shape=(
            jax.ShapeDtypeStruct((N, nL, C4, 1), f32),
            jax.ShapeDtypeStruct((N, nL, C4, 1), f32),
        ),
        grid_spec=pltpu.PrefetchScalarGridSpec(
            num_scalar_prefetch=0,
            grid=(N, nL),
            in_specs=[
                pl.BlockSpec((1, Cin, tl), lambda n, l: (n, 0, l)),
                pl.BlockSpec((C4, Cin), lambda n, l: (0, 0)),
            ],
            out_specs=[
                pl.BlockSpec((1, 1, C4, 1), lambda n, l: (n, l, 0, 0)),
                pl.BlockSpec((1, 1, C4, 1), lambda n, l: (n, l, 0, 0)),
            ],
        ),
        compiler_params=cparams,
    )(x3, w_t)

    # --- BatchNorm batch statistics (tiny per-channel scalars, plain JAX) -----
    count = f32(M)                                  # padded lanes contribute 0
    col_mean_nb = psum.sum(axis=(0, 1)).reshape(C4) / count     # E[y_nb]
    col_ey2_nb = psq.sum(axis=(0, 1)).reshape(C4) / count       # E[y_nb^2]
    # Fold the conv bias in analytically: y = y_nb + b
    col_mean = col_mean_nb + b_col
    col_ey2 = col_ey2_nb + 2.0 * b_col * col_mean_nb + b_col * b_col
    # Per output channel: its pixels are KH*KW equally-sized column groups.
    mean_c = col_mean.reshape(Cout, KH * KW).mean(axis=1)
    ey2_c = col_ey2.reshape(Cout, KH * KW).mean(axis=1)
    var_c = jnp.maximum(ey2_c - mean_c * mean_c, 0.0)   # clamp: cancellation
    inv_std = jax.lax.rsqrt(var_c + eps)
    scale_c = gamma.astype(f32) * inv_std               # (Cout,)
    shift_c = beta.astype(f32) - mean_c * scale_c       # (Cout,)
    scale_col = jnp.repeat(scale_c, KH * KW)             # (C4,)
    shift_col = jnp.repeat(shift_c, KH * KW) + b_col * scale_col   # bias folded
    scale_col = scale_col.reshape(C4, 1)
    shift_col = shift_col.reshape(C4, 1)

    # --- pass 2: recompute deconv + fused BN + LeakyReLU, lane-dense output ---
    out_t = pl.pallas_call(
        functools.partial(_bn_lrelu_kernel, Cin),
        out_shape=jax.ShapeDtypeStruct((N, C4, HWp), f32),
        grid_spec=pltpu.PrefetchScalarGridSpec(
            num_scalar_prefetch=0,
            grid=(N, nL),
            in_specs=[
                pl.BlockSpec((1, Cin, tl), lambda n, l: (n, 0, l)),
                pl.BlockSpec((C4, Cin), lambda n, l: (0, 0)),
                pl.BlockSpec((C4, 1), lambda n, l: (0, 0)),
                pl.BlockSpec((C4, 1), lambda n, l: (0, 0)),
            ],
            out_specs=pl.BlockSpec((1, C4, tl), lambda n, l: (n, 0, l)),
        ),
        compiler_params=cparams,
    )(x3, w_t, scale_col, shift_col)

    # --- scatter back to NCHW ---------------------------------------------
    # TODO(synk): this final (co,kh,kw,h,w)->(co,2h+kh,2w+kw) interleave is the
    # one remaining XLA relayout pass over the output; writing NCHW directly
    # from the kernel needs an in-kernel lane/sublane pixel-shuffle that does
    # not lower robustly across Mosaic versions.
    if HWp != HW:
        out_t = out_t[:, :, :HW]
    out6 = out_t.reshape(N, Cout, KH, KW, H, W)
    out = jnp.transpose(out6, (0, 1, 4, 2, 5, 3)).reshape(N, Cout, KH * H, KW * W)
    return out


# ---------------------------------------------------------------------------
# Pure-JAX reference (for verification)
# ---------------------------------------------------------------------------
def _reference(x, weight, bias, gamma, beta, eps=1e-5):
    y = jnp.einsum("nihw,iokl->nohkwl", x, weight)         # (N,Co,H,2,W,2)
    N, Co, H, _, W, _ = y.shape
    y = y.reshape(N, Co, 2 * H, 2 * W) + bias[None, :, None, None]
    mean = y.mean(axis=(0, 2, 3), keepdims=True)
    var = ((y - mean) ** 2).mean(axis=(0, 2, 3), keepdims=True)
    yn = (y - mean) / jnp.sqrt(var + eps)
    yn = yn * gamma[None, :, None, None] + beta[None, :, None, None]
    return jnp.where(yn >= 0, yn, 0.2 * yn)


if __name__ == "__main__":
    key = jax.random.PRNGKey(0)
    k_x, k_w, k_b = jax.random.split(key, 3)

    N, Cin, H, W = 2, 4, 16, 16
    Cout = 8

    x = jax.random.normal(k_x, (N, Cin, H, W), dtype=jnp.float32)
    # ConvTranspose2d weight layout: (in_channels, out_channels, kH, kW)
    weight = jax.random.normal(k_w, (Cin, Cout, 2, 2), dtype=jnp.float32) * 0.1
    bias = jax.random.normal(k_b, (Cout,), dtype=jnp.float32) * 0.1
    gamma = jnp.ones((Cout,), dtype=jnp.float32)   # BatchNorm2d default init
    beta = jnp.zeros((Cout,), dtype=jnp.float32)

    out = deconv_block_forward(x, weight, bias, gamma, beta)
    out = jax.block_until_ready(out)

    ref = _reference(x, weight, bias, gamma, beta)
    assert out.shape == (N, Cout, 2 * H, 2 * W)
    assert jnp.allclose(out, ref, atol=1e-4, rtol=1e-4), float(
        jnp.max(jnp.abs(out - ref)))

    print("KERNEL_OK")
</pallas_src>

<mosaic_0001>
module attributes {stable_mosaic.version = 11 : i64} {
  func.func @_stats_kernel(%arg0: i32, %arg1: i32, %arg2: memref<1x4x256xf32, #tpu.memory_space<vmem>>, %arg3: memref<32x4xf32, #tpu.memory_space<vmem>>, %arg4: memref<1x1x32x1xf32, #tpu.memory_space<vmem>>, %arg5: memref<1x1x32x1xf32, #tpu.memory_space<vmem>>) attributes {dimension_semantics = [#tpu.dimension_semantics<parallel>, #tpu.dimension_semantics<parallel>], iteration_bounds = array<i64: 2, 1>, scalar_prefetch = 0 : i64, scratch_operands = 0 : i64, tpu.core_type = #tpu.core_type<tc>, window_params = [{transform_indices = @transform_0, window_bounds = array<i64: 1, 4, 256>}, {pipeline_mode = #tpu.pipeline_mode<synchronous>, transform_indices = @transform_1, window_bounds = array<i64: 32, 4>}, {transform_indices = @transform_2, window_bounds = array<i64: 1, 1, 32, 1>}, {transform_indices = @transform_3, window_bounds = array<i64: 1, 1, 32, 1>}]} {
    %c0 = arith.constant 0 : index
    %c0_0 = arith.constant 0 : index
    %c0_1 = arith.constant 0 : index
    %0 = vector.load %arg2[%c0, %c0_0, %c0_1] : memref<1x4x256xf32, #tpu.memory_space<vmem>>, vector<1x4x256xf32>
    %1 = vector.shape_cast %0 : vector<1x4x256xf32> to vector<4x256xf32>
    %c0_2 = arith.constant 0 : index
    %c0_3 = arith.constant 0 : index
    %2 = vector.load %arg3[%c0_2, %c0_3] : memref<32x4xf32, #tpu.memory_space<vmem>>, vector<32x4xf32>
    %3 = vector.extract_strided_slice %2 {offsets = [0, 0], sizes = [32, 1], strides = [1, 1]} : vector<32x4xf32> to vector<32x1xf32>
    %4 = vector.extract_strided_slice %1 {offsets = [0, 0], sizes = [1, 256], strides = [1, 1]} : vector<4x256xf32> to vector<1x256xf32>
    %5 = vector.broadcast %3 : vector<32x1xf32> to vector<32x256xf32>
    %6 = vector.broadcast %4 : vector<1x256xf32> to vector<32x256xf32>
    %7 = arith.mulf %5, %6 : vector<32x256xf32>
    %8 = vector.extract_strided_slice %2 {offsets = [0, 1], sizes = [32, 1], strides = [1, 1]} : vector<32x4xf32> to vector<32x1xf32>
    %9 = vector.extract_strided_slice %1 {offsets = [1, 0], sizes = [1, 256], strides = [1, 1]} : vector<4x256xf32> to vector<1x256xf32>
    %10 = vector.broadcast %8 : vector<32x1xf32> to vector<32x256xf32>
    %11 = vector.broadcast %9 : vector<1x256xf32> to vector<32x256xf32>
    %12 = arith.mulf %10, %11 : vector<32x256xf32>
    %13 = arith.addf %7, %12 : vector<32x256xf32>
    %14 = vector.extract_strided_slice %2 {offsets = [0, 2], sizes = [32, 1], strides = [1, 1]} : vector<32x4xf32> to vector<32x1xf32>
    %15 = vector.extract_strided_slice %1 {offsets = [2, 0], sizes = [1, 256], strides = [1, 1]} : vector<4x256xf32> to vector<1x256xf32>
    %16 = vector.broadcast %14 : vector<32x1xf32> to vector<32x256xf32>
    %17 = vector.broadcast %15 : vector<1x256xf32> to vector<32x256xf32>
    %18 = arith.mulf %16, %17 : vector<32x256xf32>
    %19 = arith.addf %13, %18 : vector<32x256xf32>
    %20 = vector.extract_strided_slice %2 {offsets = [0, 3], sizes = [32, 1], strides = [1, 1]} : vector<32x4xf32> to vector<32x1xf32>
    %21 = vector.extract_strided_slice %1 {offsets = [3, 0], sizes = [1, 256], strides = [1, 1]} : vector<4x256xf32> to vector<1x256xf32>
    %22 = vector.broadcast %20 : vector<32x1xf32> to vector<32x256xf32>
    %23 = vector.broadcast %21 : vector<1x256xf32> to vector<32x256xf32>
    %24 = arith.mulf %22, %23 : vector<32x256xf32>
    %25 = arith.addf %19, %24 : vector<32x256xf32>
    %cst = arith.constant dense<0.000000e+00> : vector<32xf32>
    %26 = vector.multi_reduction <add>, %25, %cst [1] : vector<32x256xf32> to vector<32xf32>
    %27 = vector.shape_cast %26 : vector<32xf32> to vector<32x1xf32>
    %c0_4 = arith.constant 0 : index
    %c0_5 = arith.constant 0 : index
    %c0_6 = arith.constant 0 : index
    %c0_7 = arith.constant 0 : index
    %28 = vector.load %arg4[%c0_4, %c0_5, %c0_6, %c0_7] : memref<1x1x32x1xf32, #tpu.memory_space<vmem>>, vector<1x1x32x1xf32>
    %29 = vector.shape_cast %28 : vector<1x1x32x1xf32> to vector<32x1xf32>
    %30 = vector.shape_cast %27 : vector<32x1xf32> to vector<1x1x32x1xf32>
    tpu.vector_store %arg4[%c0_4, %c0_5, %c0_6, %c0_7], %30 {strides = array<i32>} : memref<1x1x32x1xf32, #tpu.memory_space<vmem>>, vector<1x1x32x1xf32>,
    %31 = arith.mulf %25, %25 : vector<32x256xf32>
    %cst_8 = arith.constant dense<0.000000e+00> : vector<32xf32>
    %32 = vector.multi_reduction <add>, %31, %cst_8 [1] : vector<32x256xf32> to vector<32xf32>
    %33 = vector.shape_cast %32 : vector<32xf32> to vector<32x1xf32>
    %c0_9 = arith.constant 0 : index
    %c0_10 = arith.constant 0 : index
    %c0_11 = arith.constant 0 : index
    %c0_12 = arith.constant 0 : index
    %34 = vector.load %arg5[%c0_9, %c0_10, %c0_11, %c0_12] : memref<1x1x32x1xf32, #tpu.memory_space<vmem>>, vector<1x1x32x1xf32>
    %35 = vector.shape_cast %34 : vector<1x1x32x1xf32> to vector<32x1xf32>
    %36 = vector.shape_cast %33 : vector<32x1xf32> to vector<1x1x32x1xf32>
    tpu.vector_store %arg5[%c0_9, %c0_10, %c0_11, %c0_12], %36 {strides = array<i32>} : memref<1x1x32x1xf32, #tpu.memory_space<vmem>>, vector<1x1x32x1xf32>,
    return
  }
  func.func @transform_0(%arg0: i32, %arg1: i32) -> (i32, i32, i32) {
    %c0_i32 = arith.constant 0 : i32
    %c0_i32_0 = arith.constant 0 : i32
    return %arg0, %c0_i32, %arg1 : i32, i32, i32
  }
  func.func @transform_1(%arg0: i32, %arg1: i32) -> (i32, i32) {
    %c0_i32 = arith.constant 0 : i32
    %c0_i32_0 = arith.constant 0 : i32
    %c0_i32_1 = arith.constant 0 : i32
    return %c0_i32, %c0_i32_0 : i32, i32
  }
  func.func @transform_2(%arg0: i32, %arg1: i32) -> (i32, i32, i32, i32) {
    %c0_i32 = arith.constant 0 : i32
    %c0_i32_0 = arith.constant 0 : i32
    %c0_i32_1 = arith.constant 0 : i32
    return %arg0, %arg1, %c0_i32, %c0_i32_0 : i32, i32, i32, i32
  }
  func.func @transform_3(%arg0: i32, %arg1: i32) -> (i32, i32, i32, i32) {
    %c0_i32 = arith.constant 0 : i32
    %c0_i32_0 = arith.constant 0 : i32
    %c0_i32_1 = arith.constant 0 : i32
    return %arg0, %arg1, %c0_i32, %c0_i32_0 : i32, i32, i32, i32
  }
}

</mosaic_0001>

<bundles_post_ra>
// kernel: tpu_custom_call.1
= control target key start
LH: loop header
LB: loop body
LE: loop exit
PB: predicated region body
PF: predicated region fallthrough
CT: control target
= control target key end

     0   :  { %s717_s12 = smov 0   ;;  %s719_s13 = smov 0   ;;  %s785_s0 = inlined_call_operand.vmem [shape: f32[2,4,256], index: 0, kind: input, shape index: {}]   ;;  %s786_s1 = inlined_call_operand.vmem [shape: f32[32,4], index: 1, kind: input, shape index: {}]   ;;  %s787_s2 = inlined_call_operand.vmem [shape: f32[2,1,32,1], index: 2, kind: output, shape index: {0}]   ;;  %s788_s3 = inlined_call_operand.vmem [shape: f32[2,1,32,1], index: 3, kind: output, shape index: {1}]  }
   0x1   :  { %s721_s14 = smov 0  }
   0x2 LB: > { %s26_s15 = sadd.s32 1, %s687_s13  ;;  %p621_p0 = scmp.ge.s32.totalorder %s691_s14, 1  ;;  %s691_s14 = sphi %s721_s14, %s14_s14   ;;  %s687_s13 = sphi %s719_s13, %s790_s13   ;;  %s683_s12 = sphi %s717_s12, %s789_s12  }
   0x3   : > { %p28_p1 = scmp.ge.s32.totalorder %s26_s15, 2  ;;  %p163_p2 = scmp.lt.s32.totalorder %s691_s14, 3 }
   0x5   : > { %s792_s15 = smov (%p28_p1, %s26_s15), 0  ;;  %p164_p3 = pnand %p621_p0, %p163_p2 }
   0x6   : > { %p205_p4 = scmp.lt.s32.totalorder (!%p164_p3), %s683_s12, 1 }
   0x7   : > { %167 = sbr.rel (%p164_p3) target bundleno = 326 (0x146), region = 28 }
   0xc   : > { %v235_v0 = vld [vmem:[%s786_s1 + $0x10] sm:$0xff]  ;;  %v233_v1 = vld [vmem:[%s786_s1] sm:$0xff]  ;;  %v693_v2 = vmov 0   ;;  %v236_v3 = vld [vmem:[%s786_s1 + $0x18] sm:$0xff]  ;;  %v694_v5 = vmov 1   ;;  %v695_v6 = vmov 2   ;;  %v258_v8 = vlaneseq }
   0xd   : > { %662 = vset.pattern.permute.xlu1 %v693_v2  ;;  %661 = vset.pattern.permute.xlu0 %v693_v2  ;;  %v234_v4 = vld [vmem:[%s786_s1 + $0x8] sm:$0xff]  ;;  %v696_v7 = vmov 3   ;;  %s794_s12 = smov (!%p205_p4, %s683_s12), 1  ;;  %vm446_vm0 = vcmask 7168  }
   0xe   : > { %249 = vperm.xlu1 %662, %v235_v0   ;;  %239 = vperm.xlu0 %661, %v233_v1   ;;  %s630_s24 = sshll.u32 %s794_s12, 3  ;;  %v259_v11 = vshrl.u32 %v258_v8, 7  ;;  %s631_s28 = sshll.u32 %s794_s12, 5 }
   0xf   : > { %s212_s27 = scalar_lea.vmem %s785_s0, %s630_s24  ;;  %s222_s4 = scalar_lea.vmem %s787_s2, %s631_s28 }
  0x10   : > { %v302_v14 = vsub.s32 1, %v259_v11  ;;  %v306_v15 = vsub.s32 5, %v259_v11  ;;  %v260_v16 = vsub.s32 0, %v259_v11  ;;  %v264_v17 = vsub.s32 4, %v259_v11  ;;  %v232_v18 = vld [vmem:[%s212_s27] sm:$0xff]  ;;  %s231_s7 = scalar_lea.vmem %s788_s3, %s631_s28 }
  0x11   : > { %v352_v19 = vsub.s32 2, %v259_v11  ;;  %v356_v20 = vsub.s32 6, %v259_v11  ;;  %v402_v29 = vsub.s32 3, %v259_v11  ;;  %v406_v30 = vsub.s32 7, %v259_v11 }
  0x12   : > { %254 = vperm.xlu1 %662, %v236_v3   ;;  %244 = vperm.xlu0 %661, %v234_v4   ;;  %v303_v23 = vrot.slane %v232_v18, %v302_v14  ;;  %v307_v24 = vrot.slane %v232_v18, %v306_v15  ;;  %v261_v25 = vrot.slane %v232_v18, %v260_v16 }
  0x13   : > { %v265_v26 = vrot.slane %v232_v18, %v264_v17  ;;  %v353_v27 = vrot.slane %v232_v18, %v352_v19  ;;  %v357_v28 = vrot.slane %v232_v18, %v356_v20  ;;  %v403_v39 = vrot.slane %v232_v18, %v402_v29 }
  0x14   : > { %v313_v33 = vrot.slane %v303_v23, %v302_v14  ;;  %v317_v34 = vrot.slane %v307_v24, %v302_v14  ;;  %v271_v35 = vrot.slane %v261_v25, %v260_v16  ;;  %v407_v40 = vrot.slane %v232_v18, %v406_v30 }
  0x15   : > { %v275_v36 = vrot.slane %v265_v26, %v260_v16  ;;  %v363_v37 = vrot.slane %v353_v27, %v352_v19  ;;  %v367_v38 = vrot.slane %v357_v28, %v352_v19  ;;  %v413_v49 = vrot.slane %v403_v39, %v402_v29 }
  0x16   : > { %664 = vset.pattern.permute.xlu1 %v694_v5  ;;  %663 = vset.pattern.permute.xlu0 %v694_v5  ;;  %v417_v50 = vrot.slane %v407_v40, %v402_v29 }
  0x17   : > { %289 = vperm.xlu1 %664, %v234_v4   ;;  %285 = vperm.xlu0 %663, %v233_v1  }
  0x1b   : > { %293 = vperm.xlu1 %664, %v235_v0   ;;  %297 = vperm.xlu0 %663, %v236_v3  }
  0x1f   : > { %665 = vset.pattern.permute.xlu1 %v695_v6  ;;  %666 = vset.pattern.permute.xlu0 %v695_v6 }
  0x20   : > { %335 = vperm.xlu1 %665, %v233_v1   ;;  %339 = vperm.xlu0 %666, %v234_v4  }
  0x24   : > { %343 = vperm.xlu1 %665, %v235_v0   ;;  %667 = vset.pattern.permute.xlu0 %v696_v7 }
  0x25   : > { %385 = vperm.xlu0 %667, %v233_v1  }
  0x28   : > { %347 = vperm.xlu1 %665, %v236_v3  }
  0x29   : > { %397 = vperm.xlu0 %667, %v236_v3  }
  0x2c   : > { %668 = vset.pattern.permute.xlu1 %v696_v7 }
  0x2d   : > { %389 = vperm.xlu1 %668, %v234_v4  }
  0x31   : > { %393 = vperm.xlu1 %668, %v235_v0  }
  0x89   : > { %v753_v9 = vpop.permute.xlu1 %249  ;;  %v240_v10 = vpop.permute.xlu0 %239 }
  0x8a   : > { %v276_v41 = vmul.f32 %v271_v35, %v240_v10  ;;  %v277_v42 = vmul.f32 %v275_v36, %v240_v10 }
  0x8d   : > { %v255_v12 = vpop.permute.xlu1 %254  ;;  %v245_v13 = vpop.permute.xlu0 %244 }
  0x8e   : > { %v282_v55 = vmul.f32 %v271_v35, %v255_v12  ;;  %v283_v62 = vmul.f32 %v275_v36, %v255_v12  ;;  %v278_v63 = vmul.f32 %v271_v35, %v245_v13  ;;  %v279_v0 = vmul.f32 %v275_v36, %v245_v13 }
  0x8f   : > { %v280_v13 = vmul.f32 %v271_v35, %v753_v9 }
  0x92   : > { %v290_v21 = vpop.permute.xlu1 %289  ;;  %v286_v22 = vpop.permute.xlu0 %285 }
  0x93   : > { %v318_v43 = vmul.f32 %v313_v33, %v286_v22  ;;  %v319_v44 = vmul.f32 %v317_v34, %v286_v22  ;;  %v320_v1 = vmul.f32 %v313_v33, %v290_v21  ;;  %v321_v2 = vmul.f32 %v317_v34, %v290_v21 }
  0x94   : > { %v281_v21 = vmul.f32 %v275_v36, %v753_v9 }
  0x95   : > { %v326_v51 = vadd.f32 %v318_v43, %v276_v41  ;;  %v327_v52 = vadd.f32 %v319_v44, %v277_v42  ;;  %v328_v23 = vadd.f32 %v320_v1, %v278_v63  ;;  %v329_v24 = vadd.f32 %v321_v2, %v279_v0 }
  0x96   : > { %v294_v31 = vpop.permute.xlu1 %293  ;;  %v298_v32 = vpop.permute.xlu0 %297 }
  0x97   : > { %v324_v53 = vmul.f32 %v313_v33, %v298_v32  ;;  %v325_v56 = vmul.f32 %v317_v34, %v298_v32  ;;  %v322_v19 = vmul.f32 %v313_v33, %v294_v31  ;;  %v323_v20 = vmul.f32 %v317_v34, %v294_v31 }
  0x99   : > { %v332_v3 = vadd.f32 %v324_v53, %v282_v55  ;;  %v333_v7 = vadd.f32 %v325_v56, %v283_v62  ;;  %v330_v33 = vadd.f32 %v322_v19, %v280_v13  ;;  %v331_v31 = vadd.f32 %v323_v20, %v281_v21 }
  0x9b   : > { %v336_v45 = vpop.permute.xlu1 %335  ;;  %v340_v46 = vpop.permute.xlu0 %339 }
  0x9c   : > { %v368_v47 = vmul.f32 %v363_v37, %v336_v45  ;;  %v369_v48 = vmul.f32 %v367_v38, %v336_v45  ;;  %v370_v8 = vmul.f32 %v363_v37, %v340_v46  ;;  %v371_v15 = vmul.f32 %v367_v38, %v340_v46 }
  0x9e   : > { %v376_v58 = vadd.f32 %v368_v47, %v326_v51  ;;  %v377_v59 = vadd.f32 %v369_v48, %v327_v52  ;;  %v378_v30 = vadd.f32 %v370_v8, %v328_v23  ;;  %v379_v32 = vadd.f32 %v371_v15, %v329_v24 }
  0x9f   : > { %v344_v54 = vpop.permute.xlu1 %343 }
  0xa0   : > { %v386_v57 = vpop.permute.xlu0 %385  ;;  %v372_v25 = vmul.f32 %v363_v37, %v344_v54  ;;  %v373_v26 = vmul.f32 %v367_v38, %v344_v54 }
  0xa1   : > { %v418_v60 = vmul.f32 %v413_v49, %v386_v57  ;;  %v419_v61 = vmul.f32 %v417_v50, %v386_v57 }
  0xa2   : > { %v380_v35 = vadd.f32 %v372_v25, %v330_v33  ;;  %v381_v43 = vadd.f32 %v373_v26, %v331_v31 }
  0xa3   : > { %v348_v4 = vpop.permute.xlu1 %347  ;;  %v426_v5 = vadd.f32 %v418_v60, %v376_v58  ;;  %v427_v6 = vadd.f32 %v419_v61, %v377_v59 }
  0xa4   : > { %v374_v10 = vmul.f32 %v363_v37, %v348_v4  ;;  %v375_v11 = vmul.f32 %v367_v38, %v348_v4  ;;  %v398_v14 = vpop.permute.xlu0 %397 }
  0xa5   : > { %v424_v16 = vmul.f32 %v413_v49, %v398_v14  ;;  %v425_v17 = vmul.f32 %v417_v50, %v398_v14  ;;  %v434_v18 = vadd.f32 %v427_v6, %v426_v5  ;;  %v451_v54 = vmul.f32 %v426_v5, %v426_v5 }
  0xa6   : > { %v382_v12 = vadd.f32 %v374_v10, %v332_v3  ;;  %v383_v22 = vadd.f32 %v375_v11, %v333_v7  ;;  %v452_v55 = vmul.f32 %v427_v6, %v427_v6 }
  0xa7   : > { %435 = vadd.xlane.f32.xlu1 %v434_v18 }
  0xa8   : > { %v390_v27 = vpop.permute.xlu1 %389  ;;  %v432_v28 = vadd.f32 %v424_v16, %v382_v12  ;;  %v433_v29 = vadd.f32 %v425_v17, %v383_v22  ;;  %v459_v57 = vadd.f32 %v452_v55, %v451_v54 }
  0xa9   : > { %v420_v39 = vmul.f32 %v413_v49, %v390_v27  ;;  %v421_v40 = vmul.f32 %v417_v50, %v390_v27 }
  0xaa   : > { %v443_v34 = vadd.f32 %v433_v29, %v432_v28  ;;  %v457_v51 = vmul.f32 %v432_v28, %v432_v28  ;;  %v458_v52 = vmul.f32 %v433_v29, %v433_v29 }
  0xab   : > { %v428_v41 = vadd.f32 %v420_v39, %v378_v30  ;;  %v429_v42 = vadd.f32 %v421_v40, %v379_v32 }
  0xac   : > { %v394_v9 = vpop.permute.xlu1 %393  ;;  %444 = vadd.xlane.f32.xlu1 %v443_v34  ;;  %v468_v56 = vadd.f32 %v458_v52, %v457_v51 }
  0xad   : > { %v422_v36 = vmul.f32 %v413_v49, %v394_v9  ;;  %v423_v44 = vmul.f32 %v417_v50, %v394_v9  ;;  %v437_v37 = vadd.f32 %v429_v42, %v428_v41  ;;  %v453_v38 = vmul.f32 %v428_v41, %v428_v41 }
  0xae   : > { %v454_v45 = vmul.f32 %v429_v42, %v429_v42 }
  0xaf   : > { %438 = vadd.xlane.f32.xlu0 %v437_v37  ;;  %v430_v46 = vadd.f32 %v422_v36, %v380_v35  ;;  %v431_v47 = vadd.f32 %v423_v44, %v381_v43 }
  0xb0   : > { %v462_v48 = vadd.f32 %v454_v45, %v453_v38 }
  0xb1   : > { %v440_v53 = vadd.f32 %v431_v47, %v430_v46  ;;  %v455_v58 = vmul.f32 %v430_v46, %v430_v46  ;;  %v456_v49 = vmul.f32 %v431_v47, %v431_v47 }
  0xb2   : > { %463 = vadd.xlane.f32.xlu1 %v462_v48 }
  0xb3   : > { %441 = vadd.xlane.f32.xlu0 %v440_v53  ;;  %v465_v50 = vadd.f32 %v456_v49, %v455_v58 }
  0xb6   : > { %469 = vadd.xlane.f32.xlu1 %v468_v56 }
  0xb7   : > { %460 = vadd.xlane.f32.xlu0 %v459_v57 }
  0xbb   : > { %466 = vadd.xlane.f32.xlu0 %v465_v50 }
 0x130   : > { %v436_v59 = vpop.xlane.xlu1 %435 }
 0x131   : > { %447 = vst.msk [vmem:[%s222_s4] sm:$0xff] %vm446_vm0, %v436_v59 }
 0x135   : > { %v445_v60 = vpop.xlane.xlu1 %444 }
 0x136   : > { %450 = vst.msk [vmem:[%s222_s4 + $0x18] sm:$0xff] %vm446_vm0, %v445_v60 }
 0x138   : > { %v439_v61 = vpop.xlane.xlu0 %438 }
 0x139   : > { %448 = vst.msk [vmem:[%s222_s4 + $0x8] sm:$0xff] %vm446_vm0, %v439_v61 }
 0x13b   : > { %v464_v62 = vpop.xlane.xlu1 %463 }
 0x13c   : > { %472 = vst.msk [vmem:[%s231_s7 + $0x8] sm:$0xff] %vm446_vm0, %v464_v62  ;;  %v442_v63 = vpop.xlane.xlu0 %441 }
 0x13d   : > { %449 = vst.msk [vmem:[%s222_s4 + $0x10] sm:$0xff] %vm446_vm0, %v442_v63 }
 0x13f   : > { %v470_v0 = vpop.xlane.xlu1 %469 }
 0x140   : > { %474 = vst.msk [vmem:[%s231_s7 + $0x18] sm:$0xff] %vm446_vm0, %v470_v0  ;;  %v461_v1 = vpop.xlane.xlu0 %460 }
 0x141   : > { %471 = vst.msk [vmem:[%s231_s7] sm:$0xff] %vm446_vm0, %v461_v1 }
 0x144   : > { %v467_v2 = vpop.xlane.xlu0 %466 }
 0x145   : > { %473 = vst.msk [vmem:[%s231_s7 + $0x10] sm:$0xff] %vm446_vm0, %v467_v2 }
 0x146 PF: > { %s14_s14 = sadd.s32 1, %s691_s14   ;;  %s789_s12 = smov %s687_s13 }
 0x147   : > { %p11_p5 = scmp.ge.s32.totalorder %s14_s14, 4   ;;  %s790_s13 = smov %s792_s15 }
 0x149   :  { %13 = sbr.rel (!%p11_p5) target bundleno = 2 (0x2), region = 70 }

</bundles_post_ra>
